<compile_context>
chip_gen: v7x
topology: tpu7x:2x2x1
jax: 0.10.0
libtpu: 0.0.40
codegen_flags: <defaults>
</compile_context>

<pallas_src>
import jax
import jax.numpy as jnp
from jax.experimental import pallas as pl
from jax.experimental.pallas import tpu as pltpu

K = 3
H_IN = W_IN = 32
C1 = 8
C2 = 16
PAD = 2
H1 = H_IN + K - 1 - 2 * PAD      # 30
W1 = W_IN + K - 1 - 2 * PAD      # 30
H2 = H1 + K - 1 - 2 * PAD        # 28
W2 = W1 + K - 1 - 2 * PAD        # 28

ROW = W_IN                        # 32: flat-grid row stride shared by all layers
NX = H_IN * W_IN                  # 1024 flat input lanes
NXP = NX + 128                    # 1152: zero-padded input (pad is a 128-multiple)
NH = 1024                         # flat lanes carried for the hidden activation
NO = H2 * ROW                     # 896 = 28*32 output lanes (7 full vregs wide)

W1_COLS = K * K + 1               # 10: 9 taps + bias column
W2_COLS = K * K * C1 + 1          # 73: 72 taps + bias column


def fused_kernel(x_ref, wp_ref, o_ref):
    """conv_t -> relu -> conv_t -> sigmoid, fused, fully VMEM resident.

    x_ref : (1, 1024)    flat 32x32 input (row stride 32)
    wp_ref: (24, 73)     packed params:
                           rows 0:8   cols 0:10 -> layer-1 [co, dy*3+dx] + bias col
                           rows 8:24  cols 0:73 -> layer-2 [co, (dy*3+dx)*C1+ci] + bias col
    o_ref : (C2, 896)    flat NCHW output on the 32-wide grid (cols >= 28 are junk)
    """
    x = x_ref[...]                                             # (1, 1024)
    # Zero-tail so every shifted slice below stays in bounds; 1024 is a
    # 128-multiple so this concat is pure vreg placement.
    xp = jnp.concatenate([x, jnp.zeros((1, NXP - NX), jnp.float32)], axis=1)

    # ---- layer 1: one MXU matmul over the 9 taps (+ bias via ones row) ------
    x_rows = [xp[:, dy * ROW + dx: dy * ROW + dx + NH]
              for dy in range(K) for dx in range(K)]           # 9 x (1, NH)
    x_stack = jnp.concatenate(x_rows + [jnp.ones((1, NH), jnp.float32)], axis=0)
    w1 = wp_ref[0:C1, 0:W1_COLS]                               # (8, 10)
    h = jnp.maximum(
        jnp.dot(w1, x_stack, preferred_element_type=jnp.float32), 0.0)  # (8, NH)

    # ---- layer 2: one MXU matmul, contraction depth 73 (+ bias folded) ------
    h_rows = [h[:, dy * ROW + dx: dy * ROW + dx + NO]
              for dy in range(K) for dx in range(K)]           # 9 x (8, NO)
    h_stack = jnp.concatenate(h_rows + [jnp.ones((1, NO), jnp.float32)], axis=0)
    w2 = wp_ref[C1:C1 + C2, 0:W2_COLS]                         # (16, 73)
    acc = jnp.dot(w2, h_stack, preferred_element_type=jnp.float32)  # (16, NO)

    # sigmoid(x) == 0.5 * (tanh(0.5 x) + 1): single EUP op per element.
    o_ref[...] = 0.5 * (jnp.tanh(0.5 * acc) + 1.0)             # lane-dense store


def prepare_params(params):
    """One-time weight prep (hoisted out of the per-call path).

    PyTorch ConvTranspose2d weight layout: (Cin, Cout, kH, kW).
    Equivalent VALID-conv weight: w_eff[dy, dx, ci, co] = w[ci, co, K-1-dy, K-1-dx].
    Packs both layers (taps + biases) into a single (24, 73) operand.
    """
    w1_pt, b1, w2_pt, b2 = params
    w1_eff = jnp.flip(w1_pt, axis=(2, 3)).transpose(2, 3, 0, 1)      # (3,3,1,C1)
    w2_eff = jnp.flip(w2_pt, axis=(2, 3)).transpose(2, 3, 0, 1)      # (3,3,C1,C2)

    w1_ck = w1_eff.reshape(K * K, C1).T                              # (C1, 9)
    w1p = jnp.concatenate(
        [w1_ck, jnp.asarray(b1, jnp.float32).reshape(C1, 1)], axis=1)  # (8, 10)

    w2_km = w2_eff.reshape(K * K * C1, C2).T                         # (C2, 72)
    w2p = jnp.concatenate(
        [w2_km, jnp.asarray(b2, jnp.float32).reshape(C2, 1)], axis=1)  # (16, 73)

    w1p_pad = jnp.pad(w1p, ((0, 0), (0, W2_COLS - W1_COLS)))          # (8, 73)
    wp = jnp.concatenate([w1p_pad, w2p], axis=0).astype(jnp.float32)  # (24, 73)
    return wp


def model_forward(x_nchw, wp):
    # (1,1,32,32) -> (1,1024) is a contiguous (free) reshape; no transposes.
    x_flat = x_nchw.reshape(1, NX).astype(jnp.float32)

    out_flat = pl.pallas_call(
        fused_kernel,
        out_shape=jax.ShapeDtypeStruct((C2, NO), jnp.float32),
        in_specs=[pl.BlockSpec(memory_space=pltpu.MemorySpace.VMEM)] * 2,
        out_specs=pl.BlockSpec(memory_space=pltpu.MemorySpace.VMEM),
    )(x_flat, wp)

    # (C2, 28*32) -> (C2, 28, 32) is a metadata reshape; drop the 4 wrap columns
    # and add the batch dim -> already NCHW (1, 16, 28, 28).
    return out_flat.reshape(C2, H2, ROW)[None, :, :, :W2]


def _ref_forward(x_nchw, params):
    """Pure-JAX reference using XLA convs (same math, independent lowering)."""
    w1_pt, b1, w2_pt, b2 = params
    w1_hwio = jnp.flip(w1_pt, axis=(2, 3)).transpose(2, 3, 0, 1)
    w2_hwio = jnp.flip(w2_pt, axis=(2, 3)).transpose(2, 3, 0, 1)
    dn = ('NHWC', 'HWIO', 'NHWC')
    x_nhwc = x_nchw.transpose(0, 2, 3, 1)
    v1 = jax.lax.conv_general_dilated(x_nhwc, w1_hwio, (1, 1), 'VALID',
                                      dimension_numbers=dn) + b1
    v2 = jnp.maximum(v1, 0.0)
    v3 = jax.lax.conv_general_dilated(v2, w2_hwio, (1, 1), 'VALID',
                                      dimension_numbers=dn) + b2
    return jax.nn.sigmoid(v3).transpose(0, 3, 1, 2)


if __name__ == "__main__":
    key = jax.random.PRNGKey(0)
    kx, kw1, kb1, kw2, kb2 = jax.random.split(key, 5)

    # Deterministic synthetic parameters (shapes from the module's __init__).
    x = jax.random.normal(kx, (1, 1, H_IN, W_IN), jnp.float32)
    w1 = jax.random.normal(kw1, (1, C1, K, K), jnp.float32) * 0.2
    b1 = jax.random.normal(kb1, (C1,), jnp.float32) * 0.1
    w2 = jax.random.normal(kw2, (C1, C2, K, K), jnp.float32) * 0.1
    b2 = jax.random.normal(kb2, (C2,), jnp.float32) * 0.1
    params = (w1, b1, w2, b2)

    wp = prepare_params(params)               # one-time, outside the call path
    fwd = jax.jit(model_forward)

    out = jax.block_until_ready(fwd(x, wp))
    assert out.shape == (1, C2, H2, W2), out.shape

    ref = _ref_forward(x, params)
    err = float(jnp.max(jnp.abs(out - ref)))
    assert jnp.allclose(out, ref, atol=1e-4, rtol=1e-4), err

    print("KERNEL_OK")
</pallas_src>

<mosaic_0001>
module attributes {stable_mosaic.version = 11 : i64} {
  func.func @fused_kernel(%arg0: memref<1x1024xf32, #tpu.memory_space<vmem>>, %arg1: memref<24x73xf32, #tpu.memory_space<vmem>>, %arg2: memref<16x896xf32, #tpu.memory_space<vmem>>) attributes {dimension_semantics = [], scalar_prefetch = 0 : i64, scratch_operands = 0 : i64, tpu.core_type = #tpu.core_type<tc>} {
    %c0 = arith.constant 0 : index
    %c0_0 = arith.constant 0 : index
    %0 = vector.load %arg0[%c0, %c0_0] : memref<1x1024xf32, #tpu.memory_space<vmem>>, vector<1x1024xf32>
    %cst = arith.constant 0.000000e+00 : f32
    %1 = vector.broadcast %cst : f32 to vector<1x128xf32>
    %2 = tpu.concatenate %0, %1 in 1 : vector<1x1024xf32>, vector<1x128xf32> -> vector<1x1152xf32>
    %3 = vector.extract_strided_slice %2 {offsets = [0, 0], sizes = [1, 1024], strides = [1, 1]} : vector<1x1152xf32> to vector<1x1024xf32>
    %4 = vector.extract_strided_slice %2 {offsets = [0, 1], sizes = [1, 1024], strides = [1, 1]} : vector<1x1152xf32> to vector<1x1024xf32>
    %5 = vector.extract_strided_slice %2 {offsets = [0, 2], sizes = [1, 1024], strides = [1, 1]} : vector<1x1152xf32> to vector<1x1024xf32>
    %6 = vector.extract_strided_slice %2 {offsets = [0, 32], sizes = [1, 1024], strides = [1, 1]} : vector<1x1152xf32> to vector<1x1024xf32>
    %7 = vector.extract_strided_slice %2 {offsets = [0, 33], sizes = [1, 1024], strides = [1, 1]} : vector<1x1152xf32> to vector<1x1024xf32>
    %8 = vector.extract_strided_slice %2 {offsets = [0, 34], sizes = [1, 1024], strides = [1, 1]} : vector<1x1152xf32> to vector<1x1024xf32>
    %9 = vector.extract_strided_slice %2 {offsets = [0, 64], sizes = [1, 1024], strides = [1, 1]} : vector<1x1152xf32> to vector<1x1024xf32>
    %10 = vector.extract_strided_slice %2 {offsets = [0, 65], sizes = [1, 1024], strides = [1, 1]} : vector<1x1152xf32> to vector<1x1024xf32>
    %11 = vector.extract_strided_slice %2 {offsets = [0, 66], sizes = [1, 1024], strides = [1, 1]} : vector<1x1152xf32> to vector<1x1024xf32>
    %cst_1 = arith.constant 1.000000e+00 : f32
    %12 = vector.broadcast %cst_1 : f32 to vector<1x1024xf32>
    %13 = tpu.concatenate %3, %4, %5, %6, %7, %8, %9, %10, %11, %12 in 0 : vector<1x1024xf32>, vector<1x1024xf32>, vector<1x1024xf32>, vector<1x1024xf32>, vector<1x1024xf32>, vector<1x1024xf32>, vector<1x1024xf32>, vector<1x1024xf32>, vector<1x1024xf32>, vector<1x1024xf32> -> vector<10x1024xf32>
    %c0_2 = arith.constant 0 : index
    %c0_3 = arith.constant 0 : index
    %14 = vector.load %arg1[%c0_2, %c0_3] : memref<24x73xf32, #tpu.memory_space<vmem>>, vector<8x10xf32>
    %cst_4 = arith.constant dense<0.000000e+00> : vector<8x1024xf32>
    %15 = tpu.matmul %14, %13, %cst_4 {dimension_numbers = #tpu.dot_dimension_numbers<[1], [0], [0], [1], [0, 0, 1, 1], [], []>} : vector<8x10xf32>, vector<10x1024xf32>, vector<8x1024xf32> -> vector<8x1024xf32>
    %cst_5 = arith.constant 0.000000e+00 : f32
    %16 = vector.broadcast %cst_5 : f32 to vector<8x1024xf32>
    %17 = arith.maximumf %15, %16 : vector<8x1024xf32>
    %18 = vector.extract_strided_slice %17 {offsets = [0, 0], sizes = [8, 896], strides = [1, 1]} : vector<8x1024xf32> to vector<8x896xf32>
    %19 = vector.extract_strided_slice %17 {offsets = [0, 1], sizes = [8, 896], strides = [1, 1]} : vector<8x1024xf32> to vector<8x896xf32>
    %20 = vector.extract_strided_slice %17 {offsets = [0, 2], sizes = [8, 896], strides = [1, 1]} : vector<8x1024xf32> to vector<8x896xf32>
    %21 = vector.extract_strided_slice %17 {offsets = [0, 32], sizes = [8, 896], strides = [1, 1]} : vector<8x1024xf32> to vector<8x896xf32>
    %22 = vector.extract_strided_slice %17 {offsets = [0, 33], sizes = [8, 896], strides = [1, 1]} : vector<8x1024xf32> to vector<8x896xf32>
    %23 = vector.extract_strided_slice %17 {offsets = [0, 34], sizes = [8, 896], strides = [1, 1]} : vector<8x1024xf32> to vector<8x896xf32>
    %24 = vector.extract_strided_slice %17 {offsets = [0, 64], sizes = [8, 896], strides = [1, 1]} : vector<8x1024xf32> to vector<8x896xf32>
    %25 = vector.extract_strided_slice %17 {offsets = [0, 65], sizes = [8, 896], strides = [1, 1]} : vector<8x1024xf32> to vector<8x896xf32>
    %26 = vector.extract_strided_slice %17 {offsets = [0, 66], sizes = [8, 896], strides = [1, 1]} : vector<8x1024xf32> to vector<8x896xf32>
    %cst_6 = arith.constant 1.000000e+00 : f32
    %27 = vector.broadcast %cst_6 : f32 to vector<1x896xf32>
    %28 = tpu.concatenate %18, %19, %20, %21, %22, %23, %24, %25, %26, %27 in 0 : vector<8x896xf32>, vector<8x896xf32>, vector<8x896xf32>, vector<8x896xf32>, vector<8x896xf32>, vector<8x896xf32>, vector<8x896xf32>, vector<8x896xf32>, vector<8x896xf32>, vector<1x896xf32> -> vector<73x896xf32>
    %c8 = arith.constant 8 : index
    %c0_7 = arith.constant 0 : index
    %29 = vector.load %arg1[%c8, %c0_7] : memref<24x73xf32, #tpu.memory_space<vmem>>, vector<16x73xf32>
    %cst_8 = arith.constant dense<0.000000e+00> : vector<16x896xf32>
    %30 = tpu.matmul %29, %28, %cst_8 {dimension_numbers = #tpu.dot_dimension_numbers<[1], [0], [0], [1], [0, 0, 1, 1], [], []>} : vector<16x73xf32>, vector<73x896xf32>, vector<16x896xf32> -> vector<16x896xf32>
    %cst_9 = arith.constant 5.000000e-01 : f32
    %31 = vector.broadcast %cst_9 : f32 to vector<16x896xf32>
    %32 = arith.mulf %31, %30 : vector<16x896xf32>
    %33 = math.tanh %32 : vector<16x896xf32>
    %cst_10 = arith.constant 1.000000e+00 : f32
    %34 = vector.broadcast %cst_10 : f32 to vector<16x896xf32>
    %35 = arith.addf %33, %34 : vector<16x896xf32>
    %cst_11 = arith.constant 5.000000e-01 : f32
    %36 = vector.broadcast %cst_11 : f32 to vector<16x896xf32>
    %37 = arith.mulf %36, %35 : vector<16x896xf32>
    %c0_12 = arith.constant 0 : index
    %c0_13 = arith.constant 0 : index
    %38 = vector.load %arg2[%c0_12, %c0_13] : memref<16x896xf32, #tpu.memory_space<vmem>>, vector<16x896xf32>
    tpu.vector_store %arg2[%c0_12, %c0_13], %37 {strides = array<i32>} : memref<16x896xf32, #tpu.memory_space<vmem>>, vector<16x896xf32>,
    return
  }
}

</mosaic_0001>

<bundles_post_ra>
// kernel: model_forward.1
= control target key start
LH: loop header
LB: loop body
LE: loop exit
PB: predicated region body
PF: predicated region fallthrough
CT: control target
= control target key end

     0   :  { %v13_v0 = vlaneseq  ;;  %v1942_v1 = vmov 0.0   ;;  %s1944_s11 = smov 126   ;;  %s1945_s12 = smov 96   ;;  %vm2788_vm0 = vcmask 1039360   ;;  %vm125_vm1 = vcmask 1031168   ;;  %s2785_s0 = inlined_call_operand.vmem [shape: f32[1,1024], index: 0, kind: input, shape index: {}]   ;;  %s2786_s1 = inlined_call_operand.vmem [shape: f32[24,73], index: 1, kind: input, shape index: {}]   ;;  %s2787_s2 = inlined_call_operand.vmem [shape: f32[16,896], index: 2, kind: output, shape index: {}]  }
   0x1   :  { %561 = vmatprep.mubr.f32.mxu0 %v1942_v1  ;;  %632 = vmatprep.mubr.f32.mxu1 %v1942_v1  ;;  %v11_v3 = vld [vmem:[%s2785_s0] sm:$0xff]  ;;  %s1943_s0 = smov 127   ;;  %s1946_s13 = smov 95   ;;  %vm397_vm2 = vcmask 1040384   ;;  %vm406_vm3 = vcmask 1041408   ;;  %vm169_vm4 = vcmask 785408  }
   0x2   :  { %v14_v2 = vshrl.u32 %v13_v0, 7  ;;  %s1947_s14 = smov 94   ;;  %s1948_s15 = smov 64   ;;  %vm213_vm5 = vcmask 777216   ;;  %vm415_vm6 = vcmask 1042432   ;;  %vm424_vm7 = vcmask 1043456  }
   0x3   :  { %s1949_s16 = smov 62   ;;  %s1950_s17 = smov 63   ;;  %vm257_vm8 = vcmask 769024   ;;  %vm301_vm9 = vcmask 523264   ;;  %vm433_vm10 = vcmask 1044480   ;;  %vm442_vm11 = vcmask 1045504  }
   0x4   :  { %v31_v4 = vsub.s32 4, %v14_v2  ;;  %v35_v5 = vsub.s32 5, %v14_v2  ;;  %v19_v6 = vsub.s32 1, %v14_v2  ;;  %v23_v7 = vsub.s32 2, %v14_v2 }
   0x5   :  { %v15_v8 = vsub.s32 0, %v14_v2  ;;  %v27_v9 = vsub.s32 3, %v14_v2  ;;  %v39_v40 = vsub.s32 6, %v14_v2  ;;  %v43_v41 = vsub.s32 7, %v14_v2 }
   0x6   :  { %v1973_v10 = vrot.slane %v11_v3, %v31_v4  ;;  %v1975_v11 = vrot.slane %v11_v3, %v35_v5  ;;  %v1977_v12 = vrot.slane %v11_v3, %v19_v6  ;;  %v1979_v13 = vrot.slane %v11_v3, %v23_v7 }
   0x7   :  { %v1981_v14 = vrot.slane %v11_v3, %v15_v8  ;;  %v1983_v15 = vrot.slane %v11_v3, %v27_v9  ;;  %v2012_v48 = vrot.slane %v11_v3, %v39_v40  ;;  %v2014_v49 = vrot.slane %v11_v3, %v43_v41 }
   0x8   :  { %v58_v16 = vrot.slane %v1973_v10, 7  ;;  %v59_v17 = vrot.slane %v1975_v11, 7  ;;  %v55_v18 = vrot.slane %v1977_v12, 7  ;;  %v56_v19 = vrot.slane %v1979_v13, 7 }
   0x9   :  { %v99_v20 = vrot.slane %v1977_v12, 6  ;;  %v100_v21 = vrot.slane %v1979_v13, 6  ;;  %v54_v22 = vrot.slane %v1981_v14, 7  ;;  %v57_v23 = vrot.slane %v1983_v15, 7 }
   0xa   :  { %v1624_v24 = vpack.i.bf16 %v59_v17, %v58_v16  ;;  %v1614_v25 = vpack.i.bf16 %v56_v19, %v55_v18  ;;  %v102_v26 = vrot.slane %v1973_v10, 6  ;;  %v103_v27 = vrot.slane %v1975_v11, 6 }
   0xb   :  { %v1629_v28 = vpack.i.bf16 %v100_v21, %v99_v20  ;;  %v1619_v29 = vpack.i.bf16 %v57_v23, %v54_v22  ;;  %v98_v30 = vrot.slane %v1981_v14, 6  ;;  %v101_v31 = vrot.slane %v1983_v15, 6 }
   0xc   :  { %1625 = vrot.lane.b32.xlu1 %v1624_v24, %s1943_s0  ;;  %1615 = vrot.lane.b32.xlu0 %v1614_v25, %s1943_s0  ;;  %v1639_v32 = vpack.i.bf16 %v103_v27, %v102_v26  ;;  %v142_v33 = vrot.slane %v1981_v14, 5  ;;  %v145_v35 = vrot.slane %v1983_v15, 5  ;;  %v143_v36 = vrot.slane %v1977_v12, 5 }
   0xd   :  { %v1634_v34 = vpack.i.bf16 %v101_v31, %v98_v30  ;;  %v144_v37 = vrot.slane %v1979_v13, 5  ;;  %v187_v38 = vrot.slane %v1977_v12, 4  ;;  %v188_v39 = vrot.slane %v1979_v13, 4 }
   0xe   :  { %v1649_v42 = vpack.i.bf16 %v145_v35, %v142_v33  ;;  %v146_v44 = vrot.slane %v1973_v10, 5  ;;  %v147_v45 = vrot.slane %v1975_v11, 5  ;;  %v190_v47 = vrot.slane %v1973_v10, 4 }
   0xf   :  { %v1644_v43 = vpack.i.bf16 %v144_v37, %v143_v36  ;;  %v1659_v46 = vpack.i.bf16 %v188_v39, %v187_v38  ;;  %v191_v51 = vrot.slane %v1975_v11, 4  ;;  %v186_v52 = vrot.slane %v1981_v14, 4 }
  0x10   :  { %1630 = vrot.lane.b32.xlu1 %v1629_v28, %s1944_s11  ;;  %1620 = vrot.lane.b32.xlu0 %v1619_v29, %s1943_s0  ;;  %v1654_v50 = vpack.i.bf16 %v147_v45, %v146_v44  ;;  %v189_v53 = vrot.slane %v1983_v15, 4  ;;  %v60_v54 = vrot.slane %v2012_v48, 7  ;;  %v61_v55 = vrot.slane %v2014_v49, 7 }
  0x11   :  { %v1669_v56 = vpack.i.bf16 %v191_v51, %v190_v47  ;;  %v231_v58 = vrot.slane %v1977_v12, 3  ;;  %v232_v59 = vrot.slane %v1979_v13, 3  ;;  %v234_v61 = vrot.slane %v1973_v10, 3 }
  0x12   :  { %v1664_v57 = vpack.i.bf16 %v189_v53, %v186_v52  ;;  %v1679_v60 = vpack.i.bf16 %v61_v55, %v60_v54  ;;  %v235_v63 = vrot.slane %v1975_v11, 3  ;;  %v230_v0 = vrot.slane %v1981_v14, 3 }
  0x13   :  { %v1674_v62 = vpack.i.bf16 %v232_v59, %v231_v58  ;;  %v233_v2 = vrot.slane %v1983_v15, 3  ;;  %v104_v3 = vrot.slane %v2012_v48, 6  ;;  %v105_v4 = vrot.slane %v2014_v49, 6 }
  0x14   :  { %1640 = vrot.lane.b32.xlu1 %v1639_v32, %s1944_s11  ;;  %1635 = vrot.lane.b32.xlu0 %v1634_v34, %s1944_s11  ;;  %v1689_v5 = vpack.i.bf16 %v235_v63, %v234_v61  ;;  %v275_v7 = vrot.slane %v1977_v12, 2  ;;  %v276_v8 = vrot.slane %v1979_v13, 2  ;;  %v278_v16 = vrot.slane %v1973_v10, 2 }
  0x15   :  { %v1684_v6 = vpack.i.bf16 %v233_v2, %v230_v0  ;;  %v1699_v9 = vpack.i.bf16 %v105_v4, %v104_v3  ;;  %v279_v18 = vrot.slane %v1975_v11, 2  ;;  %v274_v19 = vrot.slane %v1981_v14, 2 }
  0x16   :  { %v1694_v17 = vpack.i.bf16 %v276_v8, %v275_v7  ;;  %v277_v20 = vrot.slane %v1983_v15, 2  ;;  %v319_v23 = vrot.slane %v1977_v12, 1  ;;  %v320_v24 = vrot.slane %v1979_v13, 1 }
  0x17   :  { %v1709_v21 = vpack.i.bf16 %v279_v18, %v278_v16  ;;  %v1719_v25 = vpack.i.bf16 %v1979_v13, %v1977_v12  ;;  %v318_v26 = vrot.slane %v1981_v14, 1  ;;  %v321_v28 = vrot.slane %v1983_v15, 1 }
  0x18   :  { %1650 = vrot.lane.b32.xlu1 %v1649_v42, %s1945_s12  ;;  %1645 = vrot.lane.b32.xlu0 %v1644_v43, %s1945_s12  ;;  %v1704_v22 = vpack.i.bf16 %v277_v20, %v274_v19  ;;  %v1714_v27 = vpack.i.bf16 %v320_v24, %v319_v23  ;;  %v148_v29 = vrot.slane %v2012_v48, 5  ;;  %v149_v30 = vrot.slane %v2014_v49, 5 }
  0x19   :  { %v1729_v31 = vpack.i.bf16 %v321_v28, %v318_v26  ;;  %v322_v33 = vrot.slane %v1973_v10, 1  ;;  %v323_v34 = vrot.slane %v1975_v11, 1  ;;  %v1739_v35 = vpack.i.bf16 %v1983_v15, %v1981_v14 }
  0x1a   :  { %v1724_v32 = vpack.i.bf16 %v149_v30, %v148_v29  ;;  %v192_v37 = vrot.slane %v2012_v48, 4  ;;  %v193_v38 = vrot.slane %v2014_v49, 4  ;;  %v1744_v40 = vpack.i.bf16 %v1975_v11, %v1973_v10 }
  0x1b   :  { %v1734_v36 = vpack.i.bf16 %v323_v34, %v322_v33  ;;  %v280_v41 = vrot.slane %v2012_v48, 2  ;;  %v236_v42 = vrot.slane %v2012_v48, 3  ;;  %v324_v43 = vrot.slane %v2012_v48, 1 }
  0x1c   :  { %1660 = vrot.lane.b32.xlu1 %v1659_v46, %s1946_s13  ;;  %1655 = vrot.lane.b32.xlu0 %v1654_v50, %s1945_s12  ;;  %v1749_v39 = vpack.i.bf16 %v193_v38, %v192_v37  ;;  %v106_v44 = vrot.slane %v1942_v1, 6  ;;  %v62_v45 = vrot.slane %v1942_v1, 7  ;;  %v194_v46 = vrot.slane %v1942_v1, 4 }
  0x1d   :  { %v150_v47 = vrot.slane %v1942_v1, 5  ;;  %v281_v50 = vrot.slane %v2014_v49, 2  ;;  %v282_v51 = vrot.slane %v1942_v1, 2  ;;  %v237_v52 = vrot.slane %v2014_v49, 3 }
  0x1e   :  { %v238_v53 = vrot.slane %v1942_v1, 3  ;;  %v1769_v58 = vpack.i.bf16 %v1942_v1, %v2014_v49  ;;  %vm2790_vm12 = vcmask 515072   ;;  %vm380_vm13 = vcmask 506880  }
  0x1f   :  { %v1759_v54 = vpack.i.bf16 %v282_v51, %v281_v50  ;;  %vm2791_vm14 = vcmask 1046528   ;;  %vm2789_vm15 = vmmov 1  }
  0x20   :  { %1670 = vrot.lane.b32.xlu1 %v1669_v56, %s1946_s13  ;;  %1665 = vrot.lane.b32.xlu0 %v1664_v57, %s1946_s13  ;;  %v1754_v55 = vpack.i.bf16 %v238_v53, %v237_v52  ;;  %v325_v56 = vrot.slane %v2014_v49, 1  ;;  %v326_v57 = vrot.slane %v1942_v1, 1 }
  0x22   :  { %v1764_v59 = vpack.i.bf16 %v326_v57, %v325_v56 }
  0x24   :  { %1680 = vrot.lane.b32.xlu1 %v1679_v60, %s1943_s0  ;;  %1675 = vrot.lane.b32.xlu0 %v1674_v62, %s1947_s14 }
  0x28   :  { %1690 = vrot.lane.b32.xlu1 %v1689_v5, %s1947_s14  ;;  %1685 = vrot.lane.b32.xlu0 %v1684_v6, %s1947_s14 }
  0x2c   :  { %1700 = vrot.lane.b32.xlu1 %v1699_v9, %s1944_s11  ;;  %1695 = vrot.lane.b32.xlu0 %v1694_v17, %s1948_s15 }
  0x30   :  { %1710 = vrot.lane.b32.xlu1 %v1709_v21, %s1948_s15  ;;  %1705 = vrot.lane.b32.xlu0 %v1704_v22, %s1948_s15 }
  0x34   :  { %1720 = vrot.lane.b32.xlu1 %v1719_v25, %s1949_s16  ;;  %1715 = vrot.lane.b32.xlu0 %v1714_v27, %s1950_s17 }
  0x38   :  { %1730 = vrot.lane.b32.xlu1 %v1729_v31, %s1950_s17  ;;  %1725 = vrot.lane.b32.xlu0 %v1724_v32, %s1945_s12 }
  0x3c   :  { %1740 = vrot.lane.b32.xlu1 %v1739_v35, %s1949_s16  ;;  %1735 = vrot.lane.b32.xlu0 %v1734_v36, %s1950_s17 }
  0x40   :  { %1750 = vrot.lane.b32.xlu1 %v1749_v39, %s1946_s13  ;;  %1745 = vrot.lane.b32.xlu0 %v1744_v40, %s1949_s16 }
  0x44   :  { %295 = vrot.lane.b32.xlu1 %v280_v41, %s1948_s15  ;;  %251 = vrot.lane.b32.xlu0 %v236_v42, %s1947_s14 }
  0x48   :  { %374 = vrot.lane.b32.xlu1 %v2012_v48, %s1949_s16  ;;  %339 = vrot.lane.b32.xlu0 %v324_v43, %s1950_s17 }
  0x4c   :  { %123 = vrot.lane.b32.xlu1 %v106_v44, %s1944_s11  ;;  %79 = vrot.lane.b32.xlu0 %v62_v45, %s1943_s0 }
  0x50   :  { %211 = vrot.lane.b32.xlu1 %v194_v46, %s1946_s13  ;;  %167 = vrot.lane.b32.xlu0 %v150_v47, %s1945_s12 }
  0x54   :  { %1760 = vrot.lane.b32.xlu1 %v1759_v54, %s1948_s15  ;;  %1755 = vrot.lane.b32.xlu0 %v1754_v55, %s1947_s14 }
  0x58   :  { %1770 = vrot.lane.b32.xlu1 %v1769_v58, %s1949_s16  ;;  %1765 = vrot.lane.b32.xlu0 %v1764_v59, %s1950_s17 }
  0x7e   :  { %v2101_v60 = vpop.permute.xlu1 %1625  ;;  %v1616_v61 = vpop.permute.xlu0 %1615 }
  0x7f   :  { %v1628_v9 = vunpack.i.h.bf16 %v2101_v60  ;;  %v1627_v16 = vunpack.i.l.bf16 %v2101_v60  ;;  %v1618_v17 = vunpack.i.h.bf16 %v1616_v61  ;;  %v1617_v18 = vunpack.i.l.bf16 %v1616_v61 }
  0x81   :  { %v86_v25 = vsel %vm2788_vm0, %v1627_v16, %v1628_v9  ;;  %v83_v26 = vsel %vm2788_vm0, %v1617_v18, %v1618_v17 }
  0x82   :  { %v1631_v62 = vpop.permute.xlu1 %1630  ;;  %v1621_v63 = vpop.permute.xlu0 %1620  ;;  %v402_v43 = vsel %vm397_vm2, %v1973_v10, %v86_v25  ;;  %v399_v44 = vsel %vm397_vm2, %v1977_v12, %v83_v26 }
  0x83   :  { %v1633_v19 = vunpack.i.h.bf16 %v1631_v62  ;;  %v1632_v20 = vunpack.i.l.bf16 %v1631_v62  ;;  %v1623_v21 = vunpack.i.h.bf16 %v1621_v63  ;;  %v1622_v22 = vunpack.i.l.bf16 %v1621_v63 }
  0x85   :  { %v127_v27 = vsel %vm125_vm1, %v1632_v20, %v1633_v19  ;;  %v84_v28 = vsel %vm2788_vm0, %v1618_v17, %v1623_v21  ;;  %v85_v29 = vsel %vm2788_vm0, %v1623_v21, %v1627_v16  ;;  %v82_v30 = vsel %vm2788_vm0, %v1622_v22, %v1617_v18 }
  0x86   :  { %v2103_v0 = vpop.permute.xlu1 %1640  ;;  %v1636_v2 = vpop.permute.xlu0 %1635  ;;  %v408_v47 = vsel %vm406_vm3, %v399_v44, %v127_v27  ;;  %v400_v50 = vsel %vm397_vm2, %v1979_v13, %v84_v28  ;;  %v401_v51 = vsel %vm397_vm2, %v1983_v15, %v85_v29  ;;  %v398_v52 = vsel %vm397_vm2, %v1981_v14, %v82_v30 }
  0x87   :  { %v1643_v31 = vunpack.i.h.bf16 %v2103_v0  ;;  %v1642_v32 = vunpack.i.l.bf16 %v2103_v0  ;;  %v1638_v33 = vunpack.i.h.bf16 %v1636_v2  ;;  %v1637_v34 = vunpack.i.l.bf16 %v1636_v2 }
  0x89   :  { %v130_v10 = vsel %vm125_vm1, %v1642_v32, %v1643_v31  ;;  %v128_v12 = vsel %vm125_vm1, %v1633_v19, %v1638_v33  ;;  %v129_v53 = vsel %vm125_vm1, %v1638_v33, %v1642_v32  ;;  %v126_v54 = vsel %vm125_vm1, %v1637_v34, %v1632_v20 }
  0x8a   :  { %v2105_v3 = vpop.permute.xlu1 %1650  ;;  %v2107_v4 = vpop.permute.xlu0 %1645  ;;  %v407_v16 = vsel %vm406_vm3, %v398_v52, %v126_v54  ;;  %v409_v21 = vsel %vm406_vm3, %v400_v50, %v128_v12 }
  0x8b   :  { %v1653_v35 = vunpack.i.h.bf16 %v2105_v3  ;;  %v1652_v36 = vunpack.i.l.bf16 %v2105_v3  ;;  %v1648_v39 = vunpack.i.h.bf16 %v2107_v4  ;;  %v1647_v40 = vunpack.i.l.bf16 %v2107_v4 }
  0x8d   :  { %v172_v14 = vsel %vm169_vm4, %v1648_v39, %v1653_v35  ;;  %v170_v15 = vsel %vm169_vm4, %v1652_v36, %v1647_v40  ;;  %v171_v56 = vsel %vm169_vm4, %v1647_v40, %v1648_v39 }
  0x8e   :  { %v2109_v5 = vpop.permute.xlu1 %1660  ;;  %v2111_v6 = vpop.permute.xlu0 %1655  ;;  %v416_v22 = vsel %vm415_vm6, %v407_v16, %v170_v15  ;;  %v418_v25 = vsel %vm415_vm6, %v409_v21, %v172_v14 }
  0x8f   :  { %v1663_v41 = vunpack.i.h.bf16 %v2109_v5  ;;  %v1662_v42 = vunpack.i.l.bf16 %v2109_v5  ;;  %v1658_v45 = vunpack.i.h.bf16 %v2111_v6  ;;  %v1657_v46 = vunpack.i.l.bf16 %v2111_v6 }
  0x90   :  { %v411_v5 = vsel %vm406_vm3, %v402_v43, %v130_v10 }
  0x91   :  { %v215_v57 = vsel %vm213_vm5, %v1662_v42, %v1663_v41  ;;  %v173_v58 = vsel %vm169_vm4, %v1653_v35, %v1657_v46  ;;  %v174_v59 = vsel %vm169_vm4, %v1657_v46, %v1658_v45 }
  0x92   :  { %v2113_v7 = vpop.permute.xlu1 %1670  ;;  %v2115_v8 = vpop.permute.xlu0 %1665  ;;  %v2196_v28 = vsel %vm415_vm6, %v411_v5, %v174_v59 }
  0x93   :  { %v1673_v61 = vunpack.i.h.bf16 %v2113_v7  ;;  %v1672_v62 = vunpack.i.l.bf16 %v2113_v7  ;;  %v1668_v63 = vunpack.i.h.bf16 %v2115_v8  ;;  %v1667_v2 = vunpack.i.l.bf16 %v2115_v8 }
  0x94   :  { %v410_v8 = vsel %vm406_vm3, %v401_v51, %v129_v53 }
  0x95   :  { %v419_v27 = vsel %vm415_vm6, %v410_v8, %v173_v58  ;;  %v2201_v29 = vsel %vm213_vm5, %v1672_v62, %v1673_v61  ;;  %v216_v30 = vsel %vm213_vm5, %v1663_v41, %v1668_v63  ;;  %v214_v32 = vsel %vm213_vm5, %v1667_v2, %v1662_v42 }
  0x96   :  { %v2119_v23 = vpop.permute.xlu1 %1680  ;;  %v2121_v24 = vpop.permute.xlu0 %1675  ;;  %v425_v50 = vsel %vm424_vm7, %v416_v22, %v214_v32 }
  0x97   :  { %v1678_v3 = vunpack.i.h.bf16 %v2121_v24  ;;  %v1677_v4 = vunpack.i.l.bf16 %v2121_v24  ;;  %v417_v24 = vsel %vm415_vm6, %v408_v47, %v171_v56  ;;  %v1682_v34 = vunpack.i.l.bf16 %v2119_v23 }
  0x98   :  { %v426_v26 = vsel %vm424_vm7, %v417_v24, %v215_v57  ;;  %v217_v47 = vsel %vm213_vm5, %v1668_v63, %v1672_v62 }
  0x99   :  { %v259_v33 = vsel %vm257_vm8, %v1677_v4, %v1678_v3  ;;  %v87_v54 = vsel %vm2788_vm0, %v1628_v9, %v1682_v34  ;;  %vm2240_vm0 = vmpackc.low %vm406_vm3, %vm2789_vm15  ;;  %v427_v9 = vsel %vm424_vm7, %v418_v25, %v216_v30  ;;  %v428_v5 = vsel %vm424_vm7, %v419_v27, %v217_v47 }
  0x9a   :  { %v2135_v37 = vpop.permute.xlu1 %1690  ;;  %v2137_v38 = vpop.permute.xlu0 %1685  ;;  %vm469_vm15 = vcmask 80896  }
  0x9b   :  { %v1688_v35 = vunpack.i.h.bf16 %v2137_v38  ;;  %v1687_v36 = vunpack.i.l.bf16 %v2137_v38  ;;  %v1692_v51 = vunpack.i.l.bf16 %v2135_v37  ;;  %v435_v38 = vsel %vm433_vm10, %v426_v26, %v259_v33 }
  0x9d   :  { %v258_v59 = vsel %vm257_vm8, %v1687_v36, %v1677_v4  ;;  %v260_v62 = vsel %vm257_vm8, %v1678_v3, %v1688_v35  ;;  %v403_v3 = vsel %vm397_vm2, %v1975_v11, %v87_v54  ;;  %v1693_v4 = vunpack.i.h.bf16 %v2135_v37 }
  0x9e   :  { %v2162_v55 = vpop.permute.xlu1 %1700  ;;  %v2164_v13 = vpop.permute.xlu0 %1695  ;;  %v434_v22 = vsel %vm433_vm10, %v425_v50, %v258_v59  ;;  %v436_v24 = vsel %vm433_vm10, %v427_v9, %v260_v62  ;;  %v429_v37 = vsel %vm424_vm7, %v2196_v28, %v2201_v29 }
  0x9f   :  { %v1698_v17 = vunpack.i.h.bf16 %v2164_v13  ;;  %v1697_v18 = vunpack.i.l.bf16 %v2164_v13  ;;  %v1702_v52 = vunpack.i.l.bf16 %v2162_v55 }
  0xa1   :  { %v303_v39 = vsel %vm301_vm9, %v1697_v18, %v1698_v17  ;;  %v131_v8 = vsel %vm125_vm1, %v1643_v31, %v1702_v52 }
  0xa2   :  { %v2184_v19 = vpop.permute.xlu1 %1710  ;;  %v2186_v20 = vpop.permute.xlu0 %1705  ;;  %v444_v53 = vsel %vm442_vm11, %v435_v38, %v303_v39  ;;  %v412_v33 = vsel %vm406_vm3, %v403_v3, %v131_v8 }
  0xa3   :  { %v1707_v14 = vunpack.i.l.bf16 %v2186_v20  ;;  %v1712_v63 = vunpack.i.l.bf16 %v2184_v19  ;;  %v1708_v2 = vunpack.i.h.bf16 %v2186_v20  ;;  %v261_v20 = vsel %vm257_vm8, %v1688_v35, %v1692_v51 }
  0xa4   :  { %v437_v36 = vsel %vm433_vm10, %v428_v5, %v261_v20  ;;  %v1713_v39 = vunpack.i.h.bf16 %v2184_v19  ;;  %v2314_v5 = vld [vmem:[%s2786_s1] sm:$0xff] }
  0xa5   :  { %v302_v25 = vsel %vm301_vm9, %v1707_v14, %v1697_v18  ;;  %v305_v0 = vsel %vm301_vm9, %v1708_v2, %v1712_v63 }
  0xa6   :  { %v1721_v40 = vpop.permute.xlu1 %1720  ;;  %v2212_v43 = vpop.permute.xlu0 %1715  ;;  %v443_v47 = vsel %vm442_vm11, %v434_v22, %v302_v25 }
  0xa7   :  { %v1723_v44 = vunpack.i.h.bf16 %v1721_v40  ;;  %v1722_v46 = vunpack.i.l.bf16 %v1721_v40  ;;  %v1718_v41 = vunpack.i.h.bf16 %v2212_v43  ;;  %v1717_v42 = vunpack.i.l.bf16 %v2212_v43 }
  0xa8   :  { %v304_v40 = vsel %vm301_vm9, %v1698_v17, %v1708_v2 }
  0xa9   :  { %v347_v10 = vsel %vm2790_vm12, %v1717_v42, %v1718_v41  ;;  %v382_v12 = vsel %vm380_vm13, %v1722_v46, %v1723_v44 }
  0xaa   :  { %v1731_v15 = vpop.permute.xlu1 %1730  ;;  %v2230_v56 = vpop.permute.xlu0 %1725  ;;  %v453_v57 = vsel %vm2791_vm14, %v444_v53, %v347_v10  ;;  %v461_v58 = vsel %vm397_vm2, %v382_v12, 1.0  ;;  %v446_v12 = vsel %vm442_vm11, %v437_v36, %v305_v0  ;;  %v1703_v36 = vunpack.i.h.bf16 %v2162_v55 }
  0xab   :  { %v1732_v16 = vunpack.i.l.bf16 %v1731_v15  ;;  %v1491_v21 = vpack.c.bf16 %v461_v58, %v453_v57  ;;  %v1727_v11 = vunpack.i.l.bf16 %v2230_v56  ;;  %v1733_v18 = vunpack.i.h.bf16 %v1731_v15 }
  0xac   :  { %v445_v15 = vsel %vm442_vm11, %v436_v24, %v304_v40 }
  0xad   :  { %1493 = vmatprep.subr.msk.bf16.mxu0 %vm2240_vm0, %v1491_v21  ;;  %v346_v35 = vsel %vm2790_vm12, %v1732_v16, %v1717_v42  ;;  %v175_v50 = vsel %vm169_vm4, %v1658_v45, %v1727_v11  ;;  %v348_v6 = vsel %vm2790_vm12, %v1718_v41, %v1733_v18  ;;  %v262_v16 = vsel %vm257_vm8, %v1692_v51, %v1693_v4 }
  0xae   :  { %v1741_v26 = vpop.permute.xlu1 %1740  ;;  %v2263_v27 = vpop.permute.xlu0 %1735  ;;  %v452_v53 = vsel %vm2791_vm14, %v443_v47, %v346_v35  ;;  %v454_v20 = vsel %vm2791_vm14, %v445_v15, %v348_v6  ;;  %v306_v51 = vsel %vm301_vm9, %v1712_v63, %v1713_v39  ;;  %v1728_v47 = vunpack.i.h.bf16 %v2230_v56 }
  0xaf   :  { %v1743_v31 = vunpack.i.h.bf16 %v1741_v26  ;;  %v1742_v30 = vunpack.i.l.bf16 %v1741_v26  ;;  %v1737_v32 = vunpack.i.l.bf16 %v2263_v27  ;;  %v1738_v62 = vunpack.i.h.bf16 %v2263_v27 }
  0xb0   :  { %v176_v6 = vsel %vm169_vm4, %v1727_v11, %v1728_v47 }
  0xb1   :  { %v381_v43 = vsel %vm380_vm13, %v1742_v30, %v1722_v46  ;;  %v383_v13 = vsel %vm380_vm13, %v1723_v44, %v1743_v31  ;;  %v349_v54 = vsel %vm2790_vm12, %v1733_v18, %v1737_v32  ;;  %v421_v44 = vsel %vm415_vm6, %v412_v33, %v175_v50 }
  0xb2   :  { %v2283_v38 = vpop.permute.xlu1 %1750  ;;  %v1746_v42 = vpop.permute.xlu0 %1745  ;;  %v460_v10 = vsel %vm397_vm2, %v381_v43, 1.0  ;;  %v462_v59 = vsel %vm397_vm2, %v383_v13, 1.0  ;;  %v455_v7 = vsel %vm2791_vm14, %v446_v12, %v349_v54  ;;  %v350_v26 = vsel %vm2790_vm12, %v1737_v32, %v1738_v62 }
  0xb3   :  { %v1752_v17 = vunpack.i.l.bf16 %v2283_v38  ;;  %v1747_v46 = vunpack.i.l.bf16 %v1746_v42  ;;  %v1748_v14 = vunpack.i.h.bf16 %v1746_v42  ;;  %v1494_v45 = vpack.c.bf16 %v460_v10, %v452_v53 }
  0xb4   :  { %v1500_v25 = vpack.c.bf16 %v462_v59, %v454_v20  ;;  %v1683_v33 = vunpack.i.h.bf16 %v2119_v23  ;;  %v1753_v10 = vunpack.i.h.bf16 %v2283_v38 }
  0xb5   :  { %v219_v57 = vsel %vm213_vm5, %v1673_v61, %v1752_v17  ;;  %v384_v58 = vsel %vm380_vm13, %v1743_v31, %v1747_v46  ;;  %1496 = vmatpush1.bf16.msk.msra.mxu0 %vm2240_vm0, %v1494_v45  ;;  %v385_v8 = vsel %vm380_vm13, %v1747_v46, %v1748_v14  ;;  %v132_v46 = vsel %vm125_vm1, %v1702_v52, %v1703_v36 }
  0xb6   :  { %v2304_v41 = vpop.permute.xlu1 %295  ;;  %v2306_v2 = vpop.permute.xlu0 %251  ;;  %v430_v9 = vsel %vm424_vm7, %v421_v44, %v219_v57  ;;  %v463_v61 = vsel %vm397_vm2, %v384_v58, 1.0  ;;  %v464_v19 = vsel %vm397_vm2, %v385_v8, 1.0  ;;  %v220_v52 = vsel %vm213_vm5, %v1752_v17, %v1753_v10 }
  0xb7   :  { %v263_v21 = vsel %vm257_vm8, %v1693_v4, %v2306_v2  ;;  %v1497_v3 = vpack.c.bf16 %v463_v61, %v455_v7  ;;  %v307_v22 = vsel %vm301_vm9, %v1713_v39, %v2304_v41  ;;  %v438_v4 = vsel %vm433_vm10, %v429_v37, %v262_v16 }
  0xb8   :  { %v439_v24 = vsel %vm433_vm10, %v430_v9, %v263_v21  ;;  %1431 = vmatmul.mubr.msk.f32.vlgmr.msra.gmra.mrb[0].mxu0 %vm469_vm15, %v2314_v5  ;;  %v447_v31 = vsel %vm442_vm11, %v438_v4, %v306_v51 }
  0xb9   :  { %1499 = vmatprep.subr.msk.bf16.mxu1 %vm2240_vm0, %v1497_v3  ;;  %703 = vmatprep.mubr.f32.mxu0 %v1942_v1  ;;  %v448_v63 = vsel %vm442_vm11, %v439_v24, %v307_v22  ;;  %v456_v18 = vsel %vm2791_vm14, %v447_v31, %v350_v26 }
  0xba   :  { %v2338_v27 = vpop.permute.xlu1 %374  ;;  %v2340_v0 = vpop.permute.xlu0 %339  ;;  %1502 = vmatpush1.bf16.msk.msra.mxu1 %vm2240_vm0, %v1500_v25  ;;  %v1506_v39 = vpack.c.bf16 %v464_v19, %v456_v18 }
  0xbb   :  { %v386_v28 = vsel %vm380_vm13, %v1748_v14, %v2338_v27  ;;  %v351_v29 = vsel %vm2790_vm12, %v1738_v62, %v2340_v0  ;;  %vm2794_vm12 = vcmask 1039360  }
  0xbc   :  { %v465_v30 = vsel %vm397_vm2, %v386_v28, 1.0  ;;  %v457_v32 = vsel %vm2791_vm14, %v448_v63, %v351_v29  ;;  %vm2795_vm14 = vmmov %vm2794_vm12 }
  0xbd   :  { %v1503_v35 = vpack.c.bf16 %v465_v30, %v457_v32  ;;  %1434 = vmatmul.mubr.msk.f32.vlgmr.msra.gmra.mrb[0].mxu1 %vm469_vm15, %v2314_v5  ;;  %v88_v42 = vsel %vm2795_vm14, %v1682_v34, %v1683_v33 }
  0xbe   :  { %v124_v40 = vpop.permute.xlu1 %123  ;;  %v80_v43 = vpop.permute.xlu0 %79  ;;  %774 = vmatprep.mubr.f32.mxu1 %v1942_v1  ;;  %v404_v34 = vsel %vm397_vm2, %v2012_v48, %v88_v42 }
  0xbf   :  { %v89_v50 = vsel %vm2794_vm12, %v1683_v33, %v80_v43  ;;  %1505 = vmatprep.subr.msk.bf16.mxu0 %vm2240_vm0, %v1503_v35  ;;  %v133_v12 = vsel %vm125_vm1, %v1703_v36, %v124_v40  ;;  %v413_v55 = vsel %vm406_vm3, %v404_v34, %v132_v46 }
  0xc0   :  { %1508 = vmatpush1.bf16.msk.msra.mxu0 %vm2240_vm0, %v1506_v39  ;;  %v405_v13 = vsel %vm397_vm2, %v2014_v49, %v89_v50  ;;  %v422_v14 = vsel %vm415_vm6, %v413_v55, %v176_v6 }
  0xc1   :  { %v414_v49 = vsel %vm406_vm3, %v405_v13, %v133_v12  ;;  %v431_v59 = vsel %vm424_vm7, %v422_v14, %v220_v52  ;;  %vm2796_vm3 = vcmask 515072  }
  0xc2   :  { %v212_v53 = vpop.permute.xlu1 %211  ;;  %v168_v54 = vpop.permute.xlu0 %167  ;;  %vm2803_vm14 = vmmov %vm2796_vm3 }
  0xc3   :  { %v177_v23 = vsel %vm169_vm4, %v1728_v47, %v168_v54  ;;  %1437 = vmatmul.mubr.msk.f32.vlgmr.msra.gmra.mrb[2].mxu0 %vm469_vm15, %v2314_v5  ;;  %v221_v56 = vsel %vm213_vm5, %v1753_v10, %v212_v53 }
  0xc4   :  { %1113 = vmatprep.mubr.f32.mxu0 %v1942_v1  ;;  %v423_v11 = vsel %vm415_vm6, %v414_v49, %v177_v23  ;;  %vm2797_vm6 = vmmov %vm2796_vm3 }
  0xc5   :  { %v432_v62 = vsel %vm424_vm7, %v423_v11, %v221_v56  ;;  %vm2798_vm7 = vcmask 1046528  }
  0xc6   :  { %v1761_v45 = vpop.permute.xlu1 %1760  ;;  %v1756_v15 = vpop.permute.xlu0 %1755 }
  0xc7   :  { %v1763_v57 = vunpack.i.h.bf16 %v1761_v45  ;;  %v1762_v48 = vunpack.i.l.bf16 %v1761_v45  ;;  %v1758_v44 = vunpack.i.h.bf16 %v1756_v15  ;;  %v1757_v58 = vunpack.i.l.bf16 %v1756_v15 }
  0xc9   :  { %v308_v38 = vsel %vm301_vm9, %v2304_v41, %v1762_v48  ;;  %v309_v17 = vsel %vm301_vm9, %v1762_v48, %v1763_v57  ;;  %v264_v9 = vsel %vm257_vm8, %v2306_v2, %v1757_v58  ;;  %v265_v7 = vsel %vm257_vm8, %v1757_v58, %v1758_v44 }
  0xca   :  { %v440_v61 = vsel %vm433_vm10, %v431_v59, %v264_v9  ;;  %v441_v16 = vsel %vm433_vm10, %v432_v62, %v265_v7  ;;  %v1771_v21 = vpop.permute.xlu1 %1770  ;;  %v1766_v3 = vpop.permute.xlu0 %1765  ;;  %vm2799_vm10 = vmmov %vm2798_vm7 }
  0xcb   :  { %v1773_v20 = vunpack.i.h.bf16 %v1771_v21  ;;  %v1772_v8 = vunpack.i.l.bf16 %v1771_v21  ;;  %v1768_v22 = vunpack.i.h.bf16 %v1766_v3  ;;  %v1767_v24 = vunpack.i.l.bf16 %v1766_v3 }
  0xcc   :  { %v449_v25 = vsel %vm442_vm11, %v440_v61, %v308_v38  ;;  %v450_v41 = vsel %vm442_vm11, %v441_v16, %v309_v17 }
  0xcd   :  { %v387_v37 = vsel %vm380_vm13, %v2338_v27, %v1772_v8  ;;  %v388_v2 = vsel %vm380_vm13, %v1772_v8, %v1773_v20  ;;  %v352_v51 = vsel %vm2796_vm3, %v2340_v0, %v1767_v24  ;;  %v353_v4 = vsel %vm2797_vm6, %v1767_v24, %v1768_v22 }
  0xce   :  { %v466_v26 = vsel %vm397_vm2, %v387_v37, 1.0  ;;  %v467_v19 = vsel %vm397_vm2, %v388_v2, 1.0  ;;  %v458_v28 = vsel %vm2798_vm7, %v449_v25, %v352_v51  ;;  %v459_v29 = vsel %vm2799_vm10, %v450_v41, %v353_v4 }
  0xcf   :  { %v1512_v63 = vpack.c.bf16 %v466_v26, %v458_v28  ;;  %v1509_v31 = vpack.c.bf16 %v467_v19, %v459_v29 }
  0xd1   :  { %1511 = vmatprep.subr.msk.bf16.mxu1 %vm2240_vm0, %v1509_v31 }
  0xd2   :  { %1514 = vmatpush1.bf16.msk.msra.mxu1 %vm2240_vm0, %v1512_v63  ;;  %vm2800_vm0 = vmmov %vm2794_vm12 }
  0xd3   :  { %vm2801_vm11 = vmmov %vm2800_vm0 }
  0xd4   :  { %vm2802_vm12 = vmmov %vm2796_vm3 }
  0xd5   :  { %1440 = vmatmul.mubr.msk.f32.vlgmr.msra.gmra.mrb[2].mxu1 %vm469_vm15, %v2314_v5  ;;  %vm2804_vm15 = vmmov 1   ;;  %vm2808_vm6 = vmmov %vm2800_vm0 }
  0xd6   :  { %1190 = vmatprep.mubr.f32.mxu1 %v1942_v1  ;;  %vm2583_vm3 = vmpackc.low %vm397_vm2, %vm2804_vm15 }
  0xd7   :  { %vm2807_vm2 = vmmov %vm2800_vm0 }
  0xd8   :  { %vm2809_vm7 = vmmov %vm2802_vm12 }
  0xd9   :  { %vm2810_vm10 = vmmov %vm2800_vm0 }
 0x18b   :  { %v2422_v27 = vpop.f32.mrb[0].mxu0 }
 0x18c   :  { %v2424_v0 = vpop.f32.mrb[1].mxu0  ;;  %v781_v60 = vmax.f32 %v2422_v27, 0.0 }
 0x18d   :  { %v782_v30 = vmax.f32 %v2424_v0, 0.0 }
 0x190   :  { %v2427_v32 = vpop.f32.mrb[0].mxu1 }
 0x191   :  { %v783_v33 = vmax.f32 %v2427_v32, 0.0  ;;  %v2430_v18 = vpop.f32.mrb[1].mxu1 }
 0x192   :  { %v784_v35 = vmax.f32 %v2430_v18, 0.0 }
 0x193   :  { %v1774_v5 = vpack.i.bf16 %v783_v33, %v782_v30 }
 0x194   :  { %v1779_v36 = vpack.i.bf16 %v784_v35, %v781_v60 }
 0x195   :  { %1775 = vrot.lane.b32.xlu0 %v1774_v5, %s1943_s0 }
 0x196   :  { %1780 = vrot.lane.b32.xlu1 %v1779_v36, %s1943_s0  ;;  %v705_v39 = vpop.f32.mrb[2].mxu0 }
 0x197   :  { %v707_v40 = vpop.f32.mrb[3].mxu0  ;;  %v2453_v50 = vmax.f32 %v705_v39, 0.0 }
 0x198   :  { %v2459_v42 = vmax.f32 %v707_v40, 0.0 }
 0x199   :  { %1790 = vrot.lane.b32.xlu0 %v1774_v5, %s1945_s12 }
 0x19a   :  { %1785 = vrot.lane.b32.xlu1 %v1774_v5, %s1944_s11  ;;  %v1849_v10 = vpack.i.bf16 %v2459_v42, %v2453_v50 }
 0x19d   :  { %1800 = vrot.lane.b32.xlu0 %v1779_v36, %s1945_s12 }
 0x19e   :  { %1795 = vrot.lane.b32.xlu1 %v1779_v36, %s1944_s11 }
 0x1a1   :  { %1810 = vrot.lane.b32.xlu0 %v1774_v5, %s1947_s14 }
 0x1a2   :  { %1805 = vrot.lane.b32.xlu1 %v1774_v5, %s1946_s13 }
 0x1a5   :  { %1820 = vrot.lane.b32.xlu0 %v1779_v36, %s1947_s14 }
 0x1a6   :  { %1815 = vrot.lane.b32.xlu1 %v1779_v36, %s1946_s13 }
 0x1a8   :  { %v776_v43 = vpop.f32.mrb[2].mxu1 }
 0x1a9   :  { %1830 = vrot.lane.b32.xlu0 %v1774_v5, %s1950_s17  ;;  %v778_v47 = vpop.f32.mrb[3].mxu1  ;;  %v2469_v13 = vmax.f32 %v776_v43, 0.0 }
 0x1aa   :  { %1825 = vrot.lane.b32.xlu1 %v1774_v5, %s1948_s15  ;;  %v788_v12 = vmax.f32 %v778_v47, 0.0 }
 0x1ab   :  { %v1894_v53 = vpack.i.bf16 %v2469_v13, %v2459_v42 }
 0x1ac   :  { %v1874_v46 = vpack.i.bf16 %v788_v12, %v2469_v13 }
 0x1ad   :  { %1840 = vrot.lane.b32.xlu0 %v1779_v36, %s1950_s17 }
 0x1ae   :  { %1835 = vrot.lane.b32.xlu1 %v1779_v36, %s1948_s15 }
 0x1b1   :  { %925 = vrot.lane.b32.xlu0 %v2453_v50, %s1947_s14 }
 0x1b2   :  { %1845 = vrot.lane.b32.xlu1 %v1774_v5, %s1949_s16 }
 0x1b5   :  { %985 = vrot.lane.b32.xlu0 %v2453_v50, %s1950_s17 }
 0x1b6   :  { %955 = vrot.lane.b32.xlu1 %v2453_v50, %s1948_s15 }
 0x1b9   :  { %1850 = vrot.lane.b32.xlu0 %v1849_v10, %s1943_s0 }
 0x1ba   :  { %1855 = vrot.lane.b32.xlu1 %v1849_v10, %s1944_s11 }
 0x1bd   :  { %1860 = vrot.lane.b32.xlu0 %v1849_v10, %s1945_s12 }
 0x1be   :  { %1870 = vrot.lane.b32.xlu1 %v1849_v10, %s1946_s13 }
 0x1c1   :  { %1865 = vrot.lane.b32.xlu0 %v1779_v36, %s1949_s16 }
 0x1c2   :  { %1875 = vrot.lane.b32.xlu1 %v1874_v46, %s1943_s0 }
 0x1c5   :  { %1015 = vrot.lane.b32.xlu0 %v2453_v50, %s1949_s16 }
 0x1c6   :  { %1880 = vrot.lane.b32.xlu1 %v1874_v46, %s1944_s11 }
 0x1c9   :  { %1885 = vrot.lane.b32.xlu0 %v1874_v46, %s1945_s12 }
 0x1ca   :  { %1890 = vrot.lane.b32.xlu1 %v1874_v46, %s1946_s13 }
 0x1cd   :  { %1895 = vrot.lane.b32.xlu0 %v1894_v53, %s1947_s14 }
 0x1ce   :  { %931 = vrot.lane.b32.xlu1 %v788_v12, %s1947_s14 }
 0x1d1   :  { %1900 = vrot.lane.b32.xlu0 %v1894_v53, %s1948_s15 }
 0x1d2   :  { %1905 = vrot.lane.b32.xlu1 %v1894_v53, %s1950_s17 }
 0x1d5   :  { %961 = vrot.lane.b32.xlu0 %v788_v12, %s1948_s15 }
 0x1d6   :  { %991 = vrot.lane.b32.xlu1 %v788_v12, %s1950_s17 }
 0x1d9   :  { %1910 = vrot.lane.b32.xlu0 %v1894_v53, %s1949_s16 }
 0x1da   :  { %1021 = vrot.lane.b32.xlu1 %v788_v12, %s1949_s16 }
 0x207   :  { %v2491_v54 = vpop.permute.xlu0 %1775 }
 0x208   :  { %v1778_v6 = vunpack.i.h.bf16 %v2491_v54  ;;  %v1777_v23 = vunpack.i.l.bf16 %v2491_v54  ;;  %v2495_v34 = vpop.permute.xlu1 %1780 }
 0x209   :  { %v1782_v49 = vunpack.i.l.bf16 %v2495_v34 }
 0x20a   :  { %v814_v55 = vsel %vm2800_vm0, %v1777_v23, %v1778_v6 }
 0x20b   :  { %v813_v52 = vsel %vm2801_vm11, %v1782_v49, %v1777_v23  ;;  %v2502_v56 = vpop.permute.xlu0 %1790  ;;  %v1515_v11 = vpack.c.bf16 %v814_v55, %v782_v30  ;;  %vm2811_vm11 = vmmov %vm2809_vm7 }
 0x20c   :  { %v1517_v14 = vpack.c.bf16 %v813_v52, %v781_v60  ;;  %v1793_v45 = vunpack.i.h.bf16 %v2502_v56  ;;  %v1792_v15 = vunpack.i.l.bf16 %v2502_v56  ;;  %v2508_v57 = vpop.permute.xlu1 %1785 }
 0x20d   :  { %v1788_v48 = vunpack.i.h.bf16 %v2508_v57  ;;  %v1787_v44 = vunpack.i.l.bf16 %v2508_v57  ;;  %1516 = vmatprep.subr.bf16.mxu0 %v1515_v11 }
 0x20e   :  { %1518 = vmatpush1.bf16.msra.mxu0 %v1517_v14  ;;  %v874_v58 = vsel %vm169_vm4, %v1792_v15, %v1793_v45 }
 0x20f   :  { %v2515_v59 = vpop.permute.xlu0 %1800  ;;  %v844_v62 = vsel %vm125_vm1, %v1787_v44, %v1788_v48 }
 0x210   :  { %v1802_v38 = vunpack.i.l.bf16 %v2515_v59  ;;  %v2521_v17 = vpop.permute.xlu1 %1795  ;;  %v1519_v9 = vpack.c.bf16 %v874_v58, %v844_v62  ;;  %v1952_v58 = vmov 1.0  }
 0x211   :  { %v1797_v7 = vunpack.i.l.bf16 %v2521_v17 }
 0x212   :  { %v873_v61 = vsel %vm169_vm4, %v1802_v38, %v1792_v15  ;;  %1520 = vmatprep.subr.bf16.mxu0 %v1519_v9  ;;  %v1783_v9 = vunpack.i.h.bf16 %v2495_v34 }
 0x213   :  { %v843_v16 = vsel %vm125_vm1, %v1797_v7, %v1787_v44  ;;  %v2526_v21 = vpop.permute.xlu0 %1810  ;;  %v1803_v7 = vunpack.i.h.bf16 %v2515_v59 }
 0x214   :  { %v1521_v3 = vpack.c.bf16 %v873_v61, %v843_v16  ;;  %v1813_v20 = vunpack.i.h.bf16 %v2526_v21  ;;  %v1812_v8 = vunpack.i.l.bf16 %v2526_v21  ;;  %v2530_v22 = vpop.permute.xlu1 %1805  ;;  %v1798_v61 = vunpack.i.h.bf16 %v2521_v17 }
 0x215   :  { %v1808_v24 = vunpack.i.h.bf16 %v2530_v22  ;;  %v1807_v25 = vunpack.i.l.bf16 %v2530_v22 }
 0x216   :  { %1522 = vmatpush1.bf16.msra.mxu0 %v1521_v3  ;;  %v934_v41 = vsel %vm257_vm8, %v1812_v8, %v1813_v20  ;;  %v845_v34 = vsel %vm125_vm1, %v1788_v48, %v1798_v61 }
 0x217   :  { %v2537_v37 = vpop.permute.xlu0 %1820  ;;  %v904_v2 = vsel %vm213_vm5, %v1807_v25, %v1808_v24 }
 0x218   :  { %v1822_v51 = vunpack.i.l.bf16 %v2537_v37  ;;  %v2543_v4 = vpop.permute.xlu1 %1815  ;;  %v1523_v26 = vpack.c.bf16 %v934_v41, %v904_v2  ;;  %v875_v41 = vsel %vm169_vm4, %v1793_v45, %v1803_v7  ;;  %v1823_v59 = vunpack.i.h.bf16 %v2537_v37 }
 0x219   :  { %v1817_v19 = vunpack.i.l.bf16 %v2543_v4  ;;  %v1818_v17 = vunpack.i.h.bf16 %v2543_v4  ;;  %v1543_v57 = vpack.c.bf16 %v875_v41, %v845_v34 }
 0x21a   :  { %v933_v28 = vsel %vm257_vm8, %v1822_v51, %v1812_v8  ;;  %1524 = vmatprep.subr.bf16.mxu0 %v1523_v26  ;;  %v935_v37 = vsel %vm257_vm8, %v1813_v20, %v1823_v59 }
 0x21b   :  { %v903_v29 = vsel %vm213_vm5, %v1817_v19, %v1807_v25  ;;  %v2548_v63 = vpop.permute.xlu0 %1830  ;;  %v815_v25 = vsel %vm2807_vm2, %v1778_v6, %v1783_v9  ;;  %v905_v18 = vsel %vm213_vm5, %v1808_v24, %v1818_v17 }
 0x21c   :  { %v1525_v31 = vpack.c.bf16 %v933_v28, %v903_v29  ;;  %v1833_v27 = vunpack.i.h.bf16 %v2548_v63  ;;  %v1832_v0 = vunpack.i.l.bf16 %v2548_v63  ;;  %v2552_v30 = vpop.permute.xlu1 %1825  ;;  %v1539_v6 = vpack.c.bf16 %v815_v25, %v783_v33 }
 0x21d   :  { %v1828_v60 = vunpack.i.h.bf16 %v2552_v30  ;;  %v1827_v5 = vunpack.i.l.bf16 %v2552_v30 }
 0x21e   :  { %1526 = vmatpush1.bf16.msra.mxu0 %v1525_v31  ;;  %v994_v36 = vsel %vm2802_vm12, %v1832_v0, %v1833_v27  ;;  %vm1039_vm12 = vcmask 596992  }
 0x21f   :  { %v2559_v39 = vpop.permute.xlu0 %1840  ;;  %v964_v40 = vsel %vm301_vm9, %v1827_v5, %v1828_v60 }
 0x220   :  { %v1842_v43 = vunpack.i.l.bf16 %v2559_v39  ;;  %v2565_v47 = vpop.permute.xlu1 %1835  ;;  %v1527_v10 = vpack.c.bf16 %v994_v36, %v964_v40  ;;  %v1547_v40 = vpack.c.bf16 %v935_v37, %v905_v18 }
 0x221   :  { %v1837_v12 = vunpack.i.l.bf16 %v2565_v47  ;;  %v1838_v20 = vunpack.i.h.bf16 %v2565_v47 }
 0x222   :  { %v993_v46 = vsel %vm2803_vm14, %v1842_v43, %v1832_v0  ;;  %1528 = vmatprep.subr.bf16.mxu0 %v1527_v10  ;;  %vm2812_vm14 = vmmov %vm2800_vm0 }
 0x223   :  { %v963_v53 = vsel %vm301_vm9, %v1837_v12, %v1827_v5  ;;  %v2570_v23 = vpop.permute.xlu0 %925 }
 0x224   :  { %v1529_v49 = vpack.c.bf16 %v993_v46, %v963_v53  ;;  %v2572_v55 = vpop.permute.xlu1 %1845  ;;  %v936_v4 = vsel %vm257_vm8, %v1823_v59, %v2570_v23 }
 0x225   :  { %v1848_v52 = vunpack.i.h.bf16 %v2572_v55  ;;  %v1847_v11 = vunpack.i.l.bf16 %v2572_v55 }
 0x226   :  { %1530 = vmatpush1.bf16.msra.mxu0 %v1529_v49 }
 0x227   :  { %v1024_v14 = vsel %vm380_vm13, %v1847_v11, %v1848_v52  ;;  %v2579_v15 = vpop.permute.xlu0 %985 }
 0x228   :  { %v1531_v62 = vpack.c.bf16 %v1952_v58, %v1024_v14  ;;  %v2588_v38 = vpop.permute.xlu1 %955 }
 0x229   :  { %v966_v36 = vsel %vm301_vm9, %v1838_v20, %v2588_v38 }
 0x22a   :  { %1533 = vmatprep.subr.msk.bf16.mxu0 %vm2583_vm3, %v1531_v62 }
 0x22b   :  { %v1851_v16 = vpop.permute.xlu0 %1850 }
 0x22c   :  { %v1852_v3 = vunpack.i.l.bf16 %v1851_v16  ;;  %v2595_v8 = vpop.permute.xlu1 %1855  ;;  %v1853_v22 = vunpack.i.h.bf16 %v1851_v16 }
 0x22d   :  { %v1857_v2 = vunpack.i.l.bf16 %v2595_v8  ;;  %v1858_v43 = vunpack.i.h.bf16 %v2595_v8 }
 0x22e   :  { %v816_v51 = vsel %vm2808_vm6, %v1783_v9, %v1852_v3  ;;  %v817_v46 = vsel %vm2800_vm0, %v1852_v3, %v1853_v22  ;;  %v965_v9 = vsel %vm301_vm9, %v1828_v60, %v1838_v20 }
 0x22f   :  { %v2610_v26 = vpop.permute.xlu0 %1860  ;;  %v1537_v54 = vpack.c.bf16 %v816_v51, %v784_v35  ;;  %v846_v32 = vsel %vm125_vm1, %v1798_v61, %v1857_v2  ;;  %v1843_v35 = vunpack.i.h.bf16 %v2559_v39  ;;  %v2661_v61 = vld [vmem:[%s2786_s1 + $0x8] sm:$0xff]  ;;  %v847_v3 = vsel %vm125_vm1, %v1857_v2, %v1858_v43  ;;  %v2680_v2 = vld [vmem:[%s2786_s1 + $0x10] sm:$0xff] }
 0x230   :  { %v1862_v56 = vunpack.i.l.bf16 %v2610_v26  ;;  %v2617_v45 = vpop.permute.xlu1 %1870  ;;  %v1863_v53 = vunpack.i.h.bf16 %v2610_v26 }
 0x231   :  { %v1872_v48 = vunpack.i.l.bf16 %v2617_v45  ;;  %1538 = vmatprep.subr.bf16.mxu1 %v1537_v54  ;;  %v996_v5 = vsel %vm2809_vm7, %v1843_v35, %v2579_v15  ;;  %v995_v62 = vsel %vm2811_vm11, %v1833_v27, %v1843_v35  ;;  %v1561_v27 = vpack.c.bf16 %v817_v46, %v2453_v50 }
 0x232   :  { %1540 = vmatpush1.bf16.msra.mxu1 %v1539_v6  ;;  %v876_v33 = vsel %vm169_vm4, %v1803_v7, %v1862_v56  ;;  %v1549_v7 = vpack.c.bf16 %v996_v5, %v966_v36  ;;  %v1551_v60 = vpack.c.bf16 %v995_v62, %v965_v9  ;;  %v877_v8 = vsel %vm169_vm4, %v1862_v56, %v1863_v53 }
 0x233   :  { %v1866_v19 = vpop.permute.xlu0 %1865  ;;  %v1541_v28 = vpack.c.bf16 %v876_v33, %v846_v32  ;;  %v906_v21 = vsel %vm213_vm5, %v1818_v17, %v1872_v48  ;;  %v1873_v34 = vunpack.i.h.bf16 %v2617_v45 }
 0x234   :  { %v1867_v24 = vunpack.i.l.bf16 %v1866_v19  ;;  %v1876_v29 = vpop.permute.xlu1 %1875  ;;  %v1545_v31 = vpack.c.bf16 %v936_v4, %v906_v21  ;;  %v1868_v49 = vunpack.i.h.bf16 %v1866_v19 }
 0x235   :  { %v1877_v0 = vunpack.i.l.bf16 %v1876_v29  ;;  %1542 = vmatprep.subr.bf16.mxu1 %v1541_v28  ;;  %v1878_v16 = vunpack.i.h.bf16 %v1876_v29  ;;  %v907_v35 = vsel %vm213_vm5, %v1872_v48, %v1873_v34 }
 0x236   :  { %v1023_v39 = vsel %vm380_vm13, %v1867_v24, %v1847_v11  ;;  %1544 = vmatpush1.bf16.msra.mxu1 %v1543_v57  ;;  %v1025_v59 = vsel %vm380_vm13, %v1848_v52, %v1868_v49  ;;  %v1565_v52 = vpack.c.bf16 %v877_v8, %v847_v3 }
 0x237   :  { %v1534_v47 = vpack.c.bf16 %v1952_v58, %v1023_v39  ;;  %v2642_v10 = vpop.permute.xlu0 %1015  ;;  %1546 = vmatprep.subr.bf16.mxu1 %v1545_v31  ;;  %v818_v12 = vsel %vm2810_vm10, %v1853_v22, %v1877_v0  ;;  %v819_v55 = vsel %vm2812_vm14, %v1877_v0, %v1878_v16  ;;  %v1556_v57 = vpack.c.bf16 %v1952_v58, %v1025_v59 }
 0x238   :  { %v2647_v14 = vpop.permute.xlu1 %1880  ;;  %v1559_v11 = vpack.c.bf16 %v818_v12, %v2459_v42  ;;  %v1026_v42 = vsel %vm380_vm13, %v1868_v49, %v2642_v10  ;;  %v1581_v4 = vpack.c.bf16 %v819_v55, %v2469_v13 }
 0x239   :  { %1536 = vmatpush1.bf16.msk.msra.mxu0 %vm2583_vm3, %v1534_v47  ;;  %v1882_v63 = vunpack.i.l.bf16 %v2647_v14  ;;  %v1553_v50 = vpack.c.bf16 %v1952_v58, %v1026_v42  ;;  %v1883_v37 = vunpack.i.h.bf16 %v2647_v14 }
 0x23a   :  { %1548 = vmatpush1.bf16.msra.mxu1 %v1547_v40  ;;  %1560 = vmatprep.subr.bf16.mxu0 %v1559_v11 }
 0x23b   :  { %v1886_v30 = vpop.permute.xlu0 %1885  ;;  %1550 = vmatprep.subr.bf16.mxu1 %v1549_v7  ;;  %v848_v26 = vsel %vm125_vm1, %v1858_v43, %v1882_v63  ;;  %v849_v0 = vsel %vm125_vm1, %v1882_v63, %v1883_v37 }
 0x23c   :  { %v1887_v25 = vunpack.i.l.bf16 %v1886_v30  ;;  %v1891_v41 = vpop.permute.xlu1 %1890  ;;  %1443 = vmatmul.mubr.msk.f32.vlgmr.msra.gmra.mrb[4].mxu0 %vm1039_vm12, %v2661_v61  ;;  %v1888_v17 = vunpack.i.h.bf16 %v1886_v30 }
 0x23d   :  { %1562 = vmatpush1.bf16.msra.mxu0 %v1561_v27  ;;  %1119 = vmatprep.mubr.f32.mxu0 %v1942_v1  ;;  %v1892_v51 = vunpack.i.l.bf16 %v1891_v41  ;;  %v1893_v13 = vunpack.i.h.bf16 %v1891_v41 }
 0x23e   :  { %1552 = vmatpush1.bf16.msra.mxu1 %v1551_v60  ;;  %v878_v54 = vsel %vm169_vm4, %v1863_v53, %v1887_v25  ;;  %v879_v19 = vsel %vm169_vm4, %v1887_v25, %v1888_v17  ;;  %vm2813_vm4 = vmmov %vm2809_vm7 }
 0x23f   :  { %v1896_v6 = vpop.permute.xlu0 %1895  ;;  %1555 = vmatprep.subr.msk.bf16.mxu1 %vm2583_vm3, %v1553_v50  ;;  %v1563_v56 = vpack.c.bf16 %v878_v54, %v848_v26  ;;  %v908_v21 = vsel %vm213_vm5, %v1873_v34, %v1892_v51  ;;  %v1585_v36 = vpack.c.bf16 %v879_v19, %v849_v0  ;;  %vm2814_vm1 = vmmov %vm2813_vm4  ;;  %v909_v53 = vsel %vm213_vm5, %v1892_v51, %v1893_v13 }
 0x240   :  { %v1898_v18 = vunpack.i.h.bf16 %v1896_v6  ;;  %v1897_v32 = vunpack.i.l.bf16 %v1896_v6  ;;  %v932_v33 = vpop.permute.xlu1 %931  ;;  %1444 = vmatmul.mubr.msk.f32.gmra.mrb[6].mxu0 %vm1039_vm12, %v2680_v2 }
 0x241   :  { %1564 = vmatprep.subr.bf16.mxu0 %v1563_v56  ;;  %1267 = vmatprep.mubr.f32.mxu0 %v1942_v1 }
 0x242   :  { %v937_v28 = vsel %vm257_vm8, %v2570_v23, %v1897_v32  ;;  %1558 = vmatpush1.bf16.msk.msra.mxu1 %vm2583_vm3, %v1556_v57  ;;  %1566 = vmatpush1.bf16.msra.mxu0 %v1565_v52  ;;  %v938_v45 = vsel %vm257_vm8, %v1897_v32, %v1898_v18  ;;  %v939_v39 = vsel %vm257_vm8, %v1898_v18, %v932_v33  ;;  %vm2815_vm8 = vmmov %vm2814_vm1 }
 0x243   :  { %v1569_v20 = vpack.c.bf16 %v937_v28, %v907_v35  ;;  %v1901_v48 = vpop.permute.xlu0 %1900  ;;  %1582 = vmatprep.subr.bf16.mxu1 %v1581_v4  ;;  %v1567_v22 = vpack.c.bf16 %v938_v45, %v908_v21  ;;  %v1589_v62 = vpack.c.bf16 %v939_v39, %v909_v53 }
 0x244   :  { %v1903_v24 = vunpack.i.h.bf16 %v1901_v48  ;;  %v1902_v29 = vunpack.i.l.bf16 %v1901_v48  ;;  %v1906_v31 = vpop.permute.xlu1 %1905 }
 0x245   :  { %v1908_v5 = vunpack.i.h.bf16 %v1906_v31  ;;  %v1907_v23 = vunpack.i.l.bf16 %v1906_v31  ;;  %1447 = vmatmul.mubr.msk.f32.vlgmr.msra.gmra.mrb[4].mxu1 %vm1039_vm12, %v2661_v61  ;;  %1568 = vmatprep.subr.bf16.mxu0 %v1567_v22 }
 0x246   :  { %v967_v40 = vsel %vm301_vm9, %v2588_v38, %v1902_v29  ;;  %1570 = vmatpush1.bf16.msra.mxu0 %v1569_v20  ;;  %1584 = vmatpush3.bf16.msra.mxu1 %v1581_v4  ;;  %v968_v43 = vsel %vm301_vm9, %v1902_v29, %v1903_v24 }
 0x247   :  { %v997_v47 = vsel %vm2813_vm4, %v2579_v15, %v1907_v23  ;;  %v962_v12 = vpop.permute.xlu0 %961  ;;  %1586 = vmatprep.subr.bf16.mxu1 %v1585_v36  ;;  %v998_v46 = vsel %vm2814_vm1, %v1907_v23, %v1908_v5  ;;  %1196 = vmatprep.mubr.f32.mxu1 %v1942_v1 }
 0x248   :  { %v1573_v49 = vpack.c.bf16 %v997_v47, %v967_v40  ;;  %v992_v14 = vpop.permute.xlu1 %991  ;;  %v1571_v11 = vpack.c.bf16 %v998_v46, %v968_v43  ;;  %v969_v38 = vsel %vm301_vm9, %v1903_v24, %v962_v12 }
 0x249   :  { %1448 = vmatmul.mubr.msk.f32.gmra.mrb[6].mxu1 %vm1039_vm12, %v2680_v2  ;;  %v999_v9 = vsel %vm2815_vm8, %v1908_v5, %v992_v14 }
 0x24a   :  { %1572 = vmatprep.subr.bf16.mxu0 %v1571_v11  ;;  %1588 = vmatpush3.bf16.msra.mxu1 %v1585_v36  ;;  %v1593_v63 = vpack.c.bf16 %v999_v9, %v969_v38 }
 0x24b   :  { %v1911_v15 = vpop.permute.xlu0 %1910  ;;  %1574 = vmatpush1.bf16.msra.mxu0 %v1573_v49  ;;  %1590 = vmatprep.subr.bf16.mxu1 %v1589_v62 }
 0x24c   :  { %v1913_v7 = vunpack.i.h.bf16 %v1911_v15  ;;  %v1912_v16 = vunpack.i.l.bf16 %v1911_v15  ;;  %v1022_v42 = vpop.permute.xlu1 %1021  ;;  %1488 = vmatprep.mubr.msk.f32.mxu1 %vm1039_vm12, %v2661_v61 }
 0x24e   :  { %v1027_v27 = vsel %vm380_vm13, %v2642_v10, %v1912_v16  ;;  %v1028_v30 = vsel %vm380_vm13, %v1912_v16, %v1913_v7  ;;  %v1029_v60 = vsel %vm380_vm13, %v1913_v7, %v1022_v42  ;;  %1592 = vmatpush3.bf16.msra.mxu1 %v1589_v62 }
 0x24f   :  { %v1575_v3 = vpack.c.bf16 %v1952_v58, %v1028_v30  ;;  %v1578_v8 = vpack.c.bf16 %v1952_v58, %v1027_v27  ;;  %1594 = vmatprep.subr.bf16.mxu1 %v1593_v63  ;;  %v1597_v25 = vpack.c.bf16 %v1952_v58, %v1029_v60 }
 0x251   :  { %1577 = vmatprep.subr.msk.bf16.mxu0 %vm2583_vm3, %v1575_v3 }
 0x252   :  { %1580 = vmatpush1.bf16.msk.msra.mxu0 %vm2583_vm3, %v1578_v8  ;;  %1596 = vmatpush3.bf16.msra.mxu1 %v1593_v63 }
 0x253   :  { %1599 = vmatprep.subr.msk.bf16.mxu1 %vm2583_vm3, %v1597_v25 }
 0x255   :  { %1451 = vmatmul.mubr.msk.f32.vlgmr.msra.gmra.mrb[8].mxu0 %vm1039_vm12, %v2661_v61 }
 0x256   :  { %1602 = vmatpush3.bf16.msk.msra.mxu1 %vm2583_vm3, %v1597_v25  ;;  %1273 = vmatprep.mubr.f32.mxu0 %v1942_v1 }
 0x259   :  { %1452 = vmatmul.mubr.msk.f32.gmra.mrb[10].mxu0 %vm1039_vm12, %v2680_v2  ;;  %1489 = vmatmul.mubr.msk.f32.vlgmr.msra.gmra.mrb[8].mxu1 %vm1039_vm12, %v2680_v2 }
 0x30f   :  { %v1115_v58 = vpop.f32.mrb[4].mxu0 }
 0x310   :  { %v1355_v10 = vmul.f32 0.5, %v1115_v58  ;;  %v1117_v41 = vpop.f32.mrb[5].mxu0 }
 0x311   :  { %v1356_v34 = vmul.f32 0.5, %v1117_v41 }
 0x312   :  { %1914 = vtanh.f32 %v1355_v10 }
 0x313   :  { %1916 = vtanh.f32 %v1356_v34  ;;  %v1121_v59 = vpop.f32.mrb[6].mxu0 }
 0x314   :  { %v1362_v50 = vmul.f32 0.5, %v1121_v59  ;;  %v1123_v61 = vpop.f32.mrb[7].mxu0 }
 0x315   :  { %v1363_v17 = vmul.f32 0.5, %v1123_v61 }
 0x316   :  { %1918 = vtanh.f32 %v1362_v50 }
 0x317   :  { %1920 = vtanh.f32 %v1363_v17 }
 0x318   :  { %v1192_v44 = vpop.f32.mrb[4].mxu1 }
 0x319   :  { %v1357_v1 = vmul.f32 0.5, %v1192_v44  ;;  %v1194_v51 = vpop.f32.mrb[5].mxu1 }
 0x31a   :  { %v1358_v26 = vmul.f32 0.5, %v1194_v51 }
 0x31b   :  { %1922 = vtanh.f32 %v1357_v1 }
 0x31c   :  { %v1915_v54 = vpop.eup %1914  ;;  %1924 = vtanh.f32 %v1358_v26  ;;  %v1198_v2 = vpop.f32.mrb[6].mxu1 }
 0x31d   :  { %v1917_v55 = vpop.eup %1916  ;;  %v1383_v52 = vadd.f32 1.0, %v1915_v54  ;;  %v1364_v6 = vmul.f32 0.5, %v1198_v2  ;;  %v1200_v56 = vpop.f32.mrb[7].mxu1 }
 0x31e   :  { %v1384_v57 = vadd.f32 1.0, %v1917_v55  ;;  %v1365_v37 = vmul.f32 0.5, %v1200_v56 }
 0x31f   :  { %v1397_v18 = vmul.f32 0.5, %v1383_v52  ;;  %1926 = vtanh.f32 %v1364_v6 }
 0x320   :  { %v1919_v32 = vpop.eup %1918  ;;  %v1398_v33 = vmul.f32 0.5, %v1384_v57  ;;  %1928 = vtanh.f32 %v1365_v37 }
 0x321   :  { %v1921_v35 = vpop.eup %1920  ;;  %1411 = vst [vmem:[%s2787_s2] sm:$0xff] %v1397_v18  ;;  %v1390_v4 = vadd.f32 1.0, %v1919_v32 }
 0x322   :  { %1412 = vst [vmem:[%s2787_s2 + $0x8] sm:$0xff] %v1398_v33  ;;  %v1391_v19 = vadd.f32 1.0, %v1921_v35 }
 0x323   :  { %v1404_v28 = vmul.f32 0.5, %v1390_v4 }
 0x324   :  { %v1405_v21 = vmul.f32 0.5, %v1391_v19 }
 0x325   :  { %v1923_v45 = vpop.eup %1922  ;;  %1418 = vst [vmem:[%s2787_s2 + $0x38] sm:$0xff] %v1404_v28 }
 0x326   :  { %v1925_v20 = vpop.eup %1924  ;;  %v1385_v48 = vadd.f32 1.0, %v1923_v45  ;;  %1419 = vst [vmem:[%s2787_s2 + $0x40] sm:$0xff] %v1405_v21 }
 0x327   :  { %v1386_v22 = vadd.f32 1.0, %v1925_v20 }
 0x328   :  { %v1399_v13 = vmul.f32 0.5, %v1385_v48  ;;  %v1269_v24 = vpop.f32.mrb[8].mxu0 }
 0x329   :  { %v1927_v29 = vpop.eup %1926  ;;  %v1400_v31 = vmul.f32 0.5, %v1386_v22  ;;  %v1359_v0 = vmul.f32 0.5, %v1269_v24  ;;  %v1271_v5 = vpop.f32.mrb[9].mxu0 }
 0x32a   :  { %v1929_v23 = vpop.eup %1928  ;;  %1413 = vst [vmem:[%s2787_s2 + $0x10] sm:$0xff] %v1399_v13  ;;  %v1392_v36 = vadd.f32 1.0, %v1927_v29  ;;  %v1360_v39 = vmul.f32 0.5, %v1271_v5 }
 0x32b   :  { %1414 = vst [vmem:[%s2787_s2 + $0x18] sm:$0xff] %v1400_v31  ;;  %v1393_v40 = vadd.f32 1.0, %v1929_v23  ;;  %1930 = vtanh.f32 %v1359_v0 }
 0x32c   :  { %v1406_v43 = vmul.f32 0.5, %v1392_v36  ;;  %1932 = vtanh.f32 %v1360_v39  ;;  %v1275_v47 = vpop.f32.mrb[10].mxu0  ;;  %v1490_v12 = vpop.f32.mrb[8].mxu1 }
 0x32d   :  { %v1407_v46 = vmul.f32 0.5, %v1393_v40  ;;  %v1366_v53 = vmul.f32 0.5, %v1275_v47  ;;  %v1368_v49 = vmul.f32 0.5, %v1490_v12  ;;  %v1277_v14 = vpop.f32.mrb[11].mxu0  ;;  %v1346_v11 = vpop.f32.mrb[9].mxu1 }
 0x32e   :  { %1420 = vst [vmem:[%s2787_s2 + $0x48] sm:$0xff] %v1406_v43  ;;  %v1367_v62 = vmul.f32 0.5, %v1277_v14  ;;  %v1361_v38 = vmul.f32 0.5, %v1346_v11 }
 0x32f   :  { %1421 = vst [vmem:[%s2787_s2 + $0x50] sm:$0xff] %v1407_v46  ;;  %1934 = vtanh.f32 %v1366_v53 }
 0x330   :  { %1936 = vtanh.f32 %v1368_v49 }
 0x331   :  { %1938 = vtanh.f32 %v1367_v62 }
 0x332   :  { %1940 = vtanh.f32 %v1361_v38 }
 0x335   :  { %v1931_v9 = vpop.eup %1930 }
 0x336   :  { %v1933_v15 = vpop.eup %1932  ;;  %v1387_v7 = vadd.f32 1.0, %v1931_v9 }
 0x337   :  { %v1388_v16 = vadd.f32 1.0, %v1933_v15 }
 0x338   :  { %v1401_v42 = vmul.f32 0.5, %v1387_v7 }
 0x339   :  { %v1935_v63 = vpop.eup %1934  ;;  %v1402_v27 = vmul.f32 0.5, %v1388_v16 }
 0x33a   :  { %v1937_v30 = vpop.eup %1936  ;;  %1415 = vst [vmem:[%s2787_s2 + $0x20] sm:$0xff] %v1401_v42  ;;  %v1394_v60 = vadd.f32 1.0, %v1935_v63 }
 0x33b   :  { %v1939_v3 = vpop.eup %1938  ;;  %1416 = vst [vmem:[%s2787_s2 + $0x28] sm:$0xff] %v1402_v27  ;;  %v1396_v8 = vadd.f32 1.0, %v1937_v30 }
 0x33c   :  { %v1941_v25 = vpop.eup %1940  ;;  %v1408_v58 = vmul.f32 0.5, %v1394_v60  ;;  %v1395_v10 = vadd.f32 1.0, %v1939_v3 }
 0x33d   :  { %v1410_v41 = vmul.f32 0.5, %v1396_v8  ;;  %v1389_v34 = vadd.f32 1.0, %v1941_v25 }
 0x33e   :  { %1422 = vst [vmem:[%s2787_s2 + $0x58] sm:$0xff] %v1408_v58  ;;  %v1409_v59 = vmul.f32 0.5, %v1395_v10 }
 0x33f   :  { %1424 = vst [vmem:[%s2787_s2 + $0x68] sm:$0xff] %v1410_v41  ;;  %v1403_v50 = vmul.f32 0.5, %v1389_v34 }
 0x340   :  { %1423 = vst [vmem:[%s2787_s2 + $0x60] sm:$0xff] %v1409_v59 }
 0x341   :  { %1417 = vst [vmem:[%s2787_s2 + $0x30] sm:$0xff] %v1403_v50 }

</bundles_post_ra>
